<compile_context>
chip_gen: v6e
topology: v6e:2x2x1
jax: 0.10.0
libtpu: 0.0.40
codegen_flags: <defaults>
</compile_context>

<pallas_src>
import functools

import jax
import jax.numpy as jnp
from jax.experimental import pallas as pl
from jax.experimental.pallas import tpu as pltpu


def _round_up(n: int, m: int) -> int:
    return ((n + m - 1) // m) * m


def _cdiv(a: int, b: int) -> int:
    return -(-a // b)


# ----------------------------------------------------------------------------- #
# Fully-fused kernel: all layers in one pallas_call, weights resident in VMEM.   #
# ----------------------------------------------------------------------------- #
def _make_fused_kernel(num_layers: int, use_output_activation: bool, matmul_dtype):
    def kernel(*refs):
        x_ref = refs[0]
        w_refs = refs[1:1 + num_layers]
        b_refs = refs[1 + num_layers:1 + 2 * num_layers]
        o_ref = refs[1 + 2 * num_layers]

        # Layer 0: single full-K matmul against W0 (input already contains the concat).
        h = jnp.dot(x_ref[...].astype(matmul_dtype), w_refs[0][...],
                    preferred_element_type=jnp.float32) + b_refs[0][...]
        for i in range(1, num_layers):
            h = jnp.maximum(h, 0.0)                       # ReLU between Linears
            h = jnp.dot(h.astype(matmul_dtype), w_refs[i][...],
                        preferred_element_type=jnp.float32) + b_refs[i][...]
        if use_output_activation:
            h = jnp.tanh(h)                               # nn.Tanh (padded cols stay 0)
        o_ref[...] = h.astype(o_ref.dtype)

    return kernel


def _mlp_forward_fused(x, action, weights, biases, *, output_size,
                       use_output_activation, block_batch, matmul_dtype,
                       single_buffer_params, vmem_cap):
    """Fused forward: grid over batch tiles, params resident in VMEM."""
    h_in = jnp.concatenate([x, action], axis=1) if action is not None else x
    batch, in_feat = h_in.shape
    num_layers = len(weights)
    out_pad = weights[-1].shape[1]                        # padded at init (lane dense)
    feat_dims = [in_feat] + [w.shape[1] for w in weights]
    max_feat = max(feat_dims)
    mm_itemsize = jnp.dtype(matmul_dtype).itemsize

    # ---- VMEM byte budget ----
    param_factor = 1 if single_buffer_params else 2
    param_bytes = param_factor * (
        sum(int(w.size) * mm_itemsize for w in weights)
        + sum(int(b.size) * 4 for b in biases))
    # double-buffered streamed input/output tiles + live f32/bf16 intermediates
    per_row_bytes = 2 * 4 * (in_feat + out_pad) + 3 * 4 * max_feat

    # ---- batch tiling: minimize padding, keep grid >= 2 for v7x megacore ----
    n_tiles = max(1, _cdiv(batch, block_batch))
    if batch >= 256:
        n_tiles = max(n_tiles, 2)
    tb = _round_up(_cdiv(batch, n_tiles), 8)
    while tb > 8 and param_bytes + tb * per_row_bytes > (vmem_cap * 9) // 10:
        tb = _round_up(_cdiv(tb, 2), 8)
    n_tiles = _cdiv(batch, tb)
    padded_batch = n_tiles * tb
    if padded_batch != batch:
        h_in = jnp.pad(h_in, ((0, padded_batch - batch), (0, 0)))

    vmem_limit = int(min(vmem_cap,
                         max(32 * 1024 * 1024,
                             (param_bytes + tb * per_row_bytes) * 3 // 2)))

    # ---- BlockSpecs: activations streamed, params resident (constant index_map) ----
    param_kwargs = {"pipeline_mode": pl.Buffered(1)} if single_buffer_params else {}
    in_specs = [pl.BlockSpec((tb, in_feat), lambda i: (i, 0))]
    for w in weights:
        in_specs.append(pl.BlockSpec(w.shape, lambda i: (0, 0), **param_kwargs))
    for b in biases:
        in_specs.append(pl.BlockSpec(b.shape, lambda i: (0, 0), **param_kwargs))
    out_spec = pl.BlockSpec((tb, out_pad), lambda i: (i, 0))

    flops = 2 * padded_batch * sum(a * b for a, b in zip(feat_dims[:-1], feat_dims[1:]))
    transcendentals = padded_batch * out_pad if use_output_activation else 0
    bytes_accessed = int(padded_batch * (in_feat + out_pad) * 4
                         + sum(int(w.size) * mm_itemsize for w in weights)
                         + sum(int(b.size) * 4 for b in biases))

    out = pl.pallas_call(
        _make_fused_kernel(num_layers, use_output_activation, matmul_dtype),
        grid=(n_tiles,),
        in_specs=in_specs,
        out_specs=out_spec,
        out_shape=jax.ShapeDtypeStruct((padded_batch, out_pad), jnp.float32),
        compiler_params=pltpu.CompilerParams(
            dimension_semantics=("parallel",),            # megacore split on v7x
            vmem_limit_bytes=vmem_limit,
        ),
        cost_estimate=pl.CostEstimate(flops=int(flops),
                                      transcendentals=int(transcendentals),
                                      bytes_accessed=bytes_accessed),
    )(h_in, *weights, *biases)

    return out[:batch, :output_size]


# ----------------------------------------------------------------------------- #
# Fallback path: per-layer pallas_call tiled over (batch, N) for large models    #
# whose weights do not fit resident in VMEM (mainly v7x's 64 MiB).               #
# ----------------------------------------------------------------------------- #
def _linear_act_kernel(x_ref, w_ref, b_ref, o_ref, *, activation, matmul_dtype):
    h = jnp.dot(x_ref[...].astype(matmul_dtype), w_ref[...],
                preferred_element_type=jnp.float32) + b_ref[...]
    if activation == "relu":
        h = jnp.maximum(h, 0.0)
    elif activation == "tanh":
        h = jnp.tanh(h)
    o_ref[...] = h.astype(o_ref.dtype)


def _mlp_forward_layered(x, action, weights, biases, *, use_output_activation,
                         block_batch, matmul_dtype, vmem_cap):
    # TODO(synk): this path re-pads/casts weights under jit each call; fine for the
    # large-model fallback, could be hoisted to init if it ever matters.
    h = jnp.concatenate([x, action], axis=1) if action is not None else x
    batch, in_feat = h.shape
    num_layers = len(weights)
    out_size = weights[-1].shape[1]
    mm_itemsize = jnp.dtype(matmul_dtype).itemsize

    # Padded feature width after each layer (lane-dense output, 128-aligned N tiling).
    dims = [in_feat]
    for li, w in enumerate(weights):
        n = w.shape[1]
        if li == num_layers - 1:
            dims.append(_round_up(max(n, 128), 128))
        else:
            dims.append(n if n <= 128 else _round_up(n, 128))

    # Batch tiling (same policy as the fused path).
    n_tiles = max(1, _cdiv(batch, block_batch))
    if batch >= 256:
        n_tiles = max(n_tiles, 2)
    tb = _round_up(_cdiv(batch, n_tiles), 8)
    max_k = max(dims)
    fixed = 2 * max_k * 128 * mm_itemsize + 2 * 128 * 4
    per_row = 4 * (2 * max_k + 3 * 128)
    while tb > 8 and fixed + tb * per_row > (vmem_cap * 9) // 10:
        tb = _round_up(_cdiv(tb, 2), 8)
    n_tiles = _cdiv(batch, tb)
    padded_batch = n_tiles * tb
    if padded_batch != batch:
        h = jnp.pad(h, ((0, padded_batch - batch), (0, 0)))

    for li, (w, b) in enumerate(zip(weights, biases)):
        is_last = li == num_layers - 1
        k_in = dims[li]
        n = w.shape[1]
        n_pad = dims[li + 1]
        if w.shape[0] != k_in:                 # match previous layer's padded width
            w = jnp.pad(w, ((0, k_in - w.shape[0]), (0, 0)))
        if n_pad != n:
            w = jnp.pad(w, ((0, 0), (0, n_pad - n)))
            b = jnp.pad(b, ((0, 0), (0, n_pad - n)))
        w = w.astype(matmul_dtype)
        tn = n_pad if n_pad <= 128 else 128
        if is_last:
            act = "tanh" if use_output_activation else "none"
        else:
            act = "relu"

        need = (2 * tb * k_in * 4 + 2 * k_in * tn * mm_itemsize + 2 * tn * 4
                + 3 * tb * tn * 4)
        vmem_limit = int(min(vmem_cap, max(32 * 1024 * 1024, need * 3 // 2)))

        h = pl.pallas_call(
            functools.partial(_linear_act_kernel, activation=act,
                              matmul_dtype=matmul_dtype),
            grid=(padded_batch // tb, n_pad // tn),
            in_specs=[pl.BlockSpec((tb, k_in), lambda i, j: (i, 0)),
                      pl.BlockSpec((k_in, tn), lambda i, j: (0, j)),
                      pl.BlockSpec((1, tn), lambda i, j: (0, j))],
            out_specs=pl.BlockSpec((tb, tn), lambda i, j: (i, j)),
            out_shape=jax.ShapeDtypeStruct((padded_batch, n_pad), jnp.float32),
            compiler_params=pltpu.CompilerParams(
                dimension_semantics=("parallel", "parallel"),
                vmem_limit_bytes=vmem_limit,
            ),
        )(h, w, b)

    return h[:batch, :out_size]


# ----------------------------------------------------------------------------- #
# Params + module wrapper                                                         #
# ----------------------------------------------------------------------------- #
def init_params(key, layer_sizes):
    """Deterministic init mimicking torch.nn.Linear default (U[-1/sqrt(fan_in), +])."""
    weights, biases = [], []
    for fan_in, fan_out in zip(layer_sizes[:-1], layer_sizes[1:]):
        key, kw, kb = jax.random.split(key, 3)
        bound = 1.0 / jnp.sqrt(jnp.float32(fan_in))
        # stored transposed vs torch: (in, out) so kernels compute x @ W
        weights.append(jax.random.uniform(kw, (fan_in, fan_out), jnp.float32, -bound, bound))
        biases.append(jax.random.uniform(kb, (1, fan_out), jnp.float32, -bound, bound))
    return weights, biases


class NetworkPallas:
    """JAX/Pallas equivalent of the PyTorch `Network` module (forward pass)."""

    # TODO(synk): layer_norm / batch_norm ctor flags are never inserted into the torch
    # Sequential either, so there is nothing to translate; activation callables are
    # fixed to ReLU (internal) / Tanh (output).

    def __init__(self, input_size: int = 1, output_size: int = 1, cat_size: int = 0,
                 hidden_layers=(256, 256), seed: int = 1234,
                 use_output_activation: bool = True, matmul_dtype=jnp.bfloat16,
                 block_batch: int = 512, max_resident_param_bytes=None):
        assert len(hidden_layers) > 0
        self.input_size = input_size
        self.output_size = output_size
        self.cat_size = cat_size
        self.use_output_activation = use_output_activation
        self.matmul_dtype = matmul_dtype
        self.block_batch = block_batch

        sizes = [input_size + cat_size, *hidden_layers, output_size]
        self.weights, self.biases = init_params(jax.random.PRNGKey(seed), sizes)

        # ---- one-time weight prep (hoisted out of forward) ----
        out_pad = _round_up(max(output_size, 128), 128)   # lane-dense last layer
        w_last, b_last = self.weights[-1], self.biases[-1]
        if out_pad != output_size:
            w_last = jnp.pad(w_last, ((0, 0), (0, out_pad - output_size)))
            b_last = jnp.pad(b_last, ((0, 0), (0, out_pad - output_size)))
        self._w_prepped = tuple(w.astype(matmul_dtype)
                                for w in (*self.weights[:-1], w_last))
        self._b_prepped = tuple((*self.biases[:-1], b_last))      # biases stay f32

        # ---- generation-aware VMEM cap ----
        try:
            info = pltpu.get_tpu_info()
            capacity = int(getattr(info, "vmem_capacity_bytes", 64 * 1024 * 1024))
        except Exception:
            capacity = 64 * 1024 * 1024
        self._vmem_cap = (capacity * 3) // 4      # ~96 MiB on v5e/v6e, ~48 MiB on v7x

        mm_itemsize = jnp.dtype(matmul_dtype).itemsize
        param_bytes = (sum(int(w.size) * mm_itemsize for w in self._w_prepped)
                       + sum(int(b.size) * 4 for b in self._b_prepped))
        if max_resident_param_bytes is None:
            max_resident_param_bytes = (self._vmem_cap * 3) // 5
        self._use_fused = param_bytes <= max_resident_param_bytes
        self._forward = None

    def _candidate_forwards(self):
        if self._use_fused:
            cfg = dict(output_size=self.output_size,
                       use_output_activation=self.use_output_activation,
                       block_batch=self.block_batch,
                       matmul_dtype=self.matmul_dtype,
                       vmem_cap=self._vmem_cap)
            w, b = self._w_prepped, self._b_prepped
            fns = []
            # Prefer single-buffered resident params; fall back if unsupported.
            for sb in (True, False):
                jitted = jax.jit(functools.partial(
                    _mlp_forward_fused, single_buffer_params=sb, **cfg))
                fns.append(lambda x, a, _j=jitted: _j(x, a, w, b))
            return fns
        jitted = jax.jit(functools.partial(
            _mlp_forward_layered,
            use_output_activation=self.use_output_activation,
            block_batch=self.block_batch,
            matmul_dtype=self.matmul_dtype,
            vmem_cap=self._vmem_cap))
        wf, bf = tuple(self.weights), tuple(self.biases)
        return [lambda x, a, _j=jitted: _j(x, a, wf, bf)]

    def __call__(self, x, action=None):
        if self._forward is not None:
            return self._forward(x, action)
        errors = []
        for fwd in self._candidate_forwards():
            try:
                out = jax.block_until_ready(fwd(x, action))
                self._forward = fwd
                return out
            except Exception as err:        # e.g. pl.Buffered(1) unsupported
                errors.append(err)
        raise errors[-1]


# ----------------------------------------------------------------------------- #
# Self-test                                                                       #
# ----------------------------------------------------------------------------- #
if __name__ == "__main__":
    batch = 2
    input_size = 8
    cat_size = 4
    hidden = (32, 32)
    output_size = 4

    key = jax.random.PRNGKey(0)
    kx, ka = jax.random.split(key)
    x = jax.random.normal(kx, (batch, input_size), jnp.float32)
    action = jax.random.normal(ka, (batch, cat_size), jnp.float32)

    def reference(net, x, action):
        h = jnp.concatenate([x, action], axis=1) if action is not None else x
        for i, (w, b) in enumerate(zip(net.weights, net.biases)):
            h = h @ w + b
            h = jnp.maximum(h, 0.0) if i < len(net.weights) - 1 else jnp.tanh(h)
        return h

    # 1) Default path: fused kernel, bf16 MXU operands (loose tolerance).
    net_bf16 = NetworkPallas(input_size=input_size, output_size=output_size,
                             cat_size=cat_size, hidden_layers=hidden, seed=1234)
    out_bf16 = jax.block_until_ready(net_bf16(x, action))
    ref = reference(net_bf16, x, action)
    assert out_bf16.shape == (batch, output_size)
    assert jnp.allclose(out_bf16, ref, atol=3e-2, rtol=3e-2), "bf16 fused kernel mismatch"

    # 2) f32 MXU path, tight tolerance.
    net_f32 = NetworkPallas(input_size=input_size, output_size=output_size,
                            cat_size=cat_size, hidden_layers=hidden, seed=1234,
                            matmul_dtype=jnp.float32)
    out_f32 = jax.block_until_ready(net_f32(x, action))
    assert jnp.allclose(out_f32, reference(net_f32, x, action), atol=1e-5), \
        "f32 fused kernel mismatch"

    # 3) Per-layer (N-tiled) fallback path, forced via max_resident_param_bytes=0.
    net_layered = NetworkPallas(input_size=input_size, output_size=output_size,
                                cat_size=cat_size, hidden_layers=hidden, seed=1234,
                                matmul_dtype=jnp.float32, max_resident_param_bytes=0)
    out_layered = jax.block_until_ready(net_layered(x, action))
    assert jnp.allclose(out_layered, reference(net_layered, x, action), atol=1e-5), \
        "layered fallback kernel mismatch"

    print("KERNEL_OK")
</pallas_src>

<mosaic_0001>
module attributes {stable_mosaic.version = 11 : i64} {
  func.func @kernel(%arg0: i32, %arg1: memref<8x12xf32, #tpu.memory_space<vmem>>, %arg2: memref<12x32xbf16, #tpu.memory_space<vmem>>, %arg3: memref<32x32xbf16, #tpu.memory_space<vmem>>, %arg4: memref<32x128xbf16, #tpu.memory_space<vmem>>, %arg5: memref<1x32xf32, #tpu.memory_space<vmem>>, %arg6: memref<1x32xf32, #tpu.memory_space<vmem>>, %arg7: memref<1x128xf32, #tpu.memory_space<vmem>>, %arg8: memref<8x128xf32, #tpu.memory_space<vmem>>) attributes {dimension_semantics = [#tpu.dimension_semantics<parallel>], iteration_bounds = array<i64: 1>, scalar_prefetch = 0 : i64, scratch_operands = 0 : i64, tpu.core_type = #tpu.core_type<tc>, window_params = [{transform_indices = @transform_0, window_bounds = array<i64: 8, 12>}, {pipeline_mode = #tpu.pipeline_mode<synchronous>, transform_indices = @transform_1, window_bounds = array<i64: 12, 32>}, {pipeline_mode = #tpu.pipeline_mode<synchronous>, transform_indices = @transform_2, window_bounds = array<i64: 32, 32>}, {pipeline_mode = #tpu.pipeline_mode<synchronous>, transform_indices = @transform_3, window_bounds = array<i64: 32, 128>}, {pipeline_mode = #tpu.pipeline_mode<synchronous>, transform_indices = @transform_4, window_bounds = array<i64: 1, 32>}, {pipeline_mode = #tpu.pipeline_mode<synchronous>, transform_indices = @transform_5, window_bounds = array<i64: 1, 32>}, {pipeline_mode = #tpu.pipeline_mode<synchronous>, transform_indices = @transform_6, window_bounds = array<i64: 1, 128>}, {transform_indices = @transform_7, window_bounds = array<i64: 8, 128>}]} {
    %c0 = arith.constant 0 : index
    %c0_0 = arith.constant 0 : index
    %0 = vector.load %arg1[%c0, %c0_0] : memref<8x12xf32, #tpu.memory_space<vmem>>, vector<8x12xf32>
    %1 = arith.truncf %0 : vector<8x12xf32> to vector<8x12xbf16>
    %c0_1 = arith.constant 0 : index
    %c0_2 = arith.constant 0 : index
    %2 = vector.load %arg2[%c0_1, %c0_2] : memref<12x32xbf16, #tpu.memory_space<vmem>>, vector<12x32xbf16>
    %cst = arith.constant dense<0.000000e+00> : vector<8x32xf32>
    %3 = tpu.matmul %1, %2, %cst {dimension_numbers = #tpu.dot_dimension_numbers<[1], [0], [0], [1], [0, 0, 1, 1], [], []>} : vector<8x12xbf16>, vector<12x32xbf16>, vector<8x32xf32> -> vector<8x32xf32>
    %c0_3 = arith.constant 0 : index
    %c0_4 = arith.constant 0 : index
    %4 = vector.load %arg5[%c0_3, %c0_4] : memref<1x32xf32, #tpu.memory_space<vmem>>, vector<1x32xf32>
    %5 = vector.broadcast %4 : vector<1x32xf32> to vector<8x32xf32>
    %6 = arith.addf %3, %5 : vector<8x32xf32>
    %cst_5 = arith.constant 0.000000e+00 : f32
    %7 = vector.broadcast %cst_5 : f32 to vector<8x32xf32>
    %8 = arith.maximumf %6, %7 : vector<8x32xf32>
    %9 = arith.truncf %8 : vector<8x32xf32> to vector<8x32xbf16>
    %c0_6 = arith.constant 0 : index
    %c0_7 = arith.constant 0 : index
    %10 = vector.load %arg3[%c0_6, %c0_7] : memref<32x32xbf16, #tpu.memory_space<vmem>>, vector<32x32xbf16>
    %cst_8 = arith.constant dense<0.000000e+00> : vector<8x32xf32>
    %11 = tpu.matmul %9, %10, %cst_8 {dimension_numbers = #tpu.dot_dimension_numbers<[1], [0], [0], [1], [0, 0, 1, 1], [], []>} : vector<8x32xbf16>, vector<32x32xbf16>, vector<8x32xf32> -> vector<8x32xf32>
    %c0_9 = arith.constant 0 : index
    %c0_10 = arith.constant 0 : index
    %12 = vector.load %arg6[%c0_9, %c0_10] : memref<1x32xf32, #tpu.memory_space<vmem>>, vector<1x32xf32>
    %13 = vector.broadcast %12 : vector<1x32xf32> to vector<8x32xf32>
    %14 = arith.addf %11, %13 : vector<8x32xf32>
    %cst_11 = arith.constant 0.000000e+00 : f32
    %15 = vector.broadcast %cst_11 : f32 to vector<8x32xf32>
    %16 = arith.maximumf %14, %15 : vector<8x32xf32>
    %17 = arith.truncf %16 : vector<8x32xf32> to vector<8x32xbf16>
    %c0_12 = arith.constant 0 : index
    %c0_13 = arith.constant 0 : index
    %18 = vector.load %arg4[%c0_12, %c0_13] : memref<32x128xbf16, #tpu.memory_space<vmem>>, vector<32x128xbf16>
    %cst_14 = arith.constant dense<0.000000e+00> : vector<8x128xf32>
    %19 = tpu.matmul %17, %18, %cst_14 {dimension_numbers = #tpu.dot_dimension_numbers<[1], [0], [0], [1], [0, 0, 1, 1], [], []>} : vector<8x32xbf16>, vector<32x128xbf16>, vector<8x128xf32> -> vector<8x128xf32>
    %c0_15 = arith.constant 0 : index
    %c0_16 = arith.constant 0 : index
    %20 = vector.load %arg7[%c0_15, %c0_16] : memref<1x128xf32, #tpu.memory_space<vmem>>, vector<1x128xf32>
    %21 = vector.broadcast %20 : vector<1x128xf32> to vector<8x128xf32>
    %22 = arith.addf %19, %21 : vector<8x128xf32>
    %23 = math.tanh %22 : vector<8x128xf32>
    %c0_17 = arith.constant 0 : index
    %c0_18 = arith.constant 0 : index
    %24 = vector.load %arg8[%c0_17, %c0_18] : memref<8x128xf32, #tpu.memory_space<vmem>>, vector<8x128xf32>
    tpu.vector_store %arg8[%c0_17, %c0_18], %23 {strides = array<i32>} : memref<8x128xf32, #tpu.memory_space<vmem>>, vector<8x128xf32>,
    return
  }
  func.func @transform_0(%arg0: i32) -> (i32, i32) {
    %c0_i32 = arith.constant 0 : i32
    %c0_i32_0 = arith.constant 0 : i32
    return %arg0, %c0_i32 : i32, i32
  }
  func.func @transform_1(%arg0: i32) -> (i32, i32) {
    %c0_i32 = arith.constant 0 : i32
    %c0_i32_0 = arith.constant 0 : i32
    %c0_i32_1 = arith.constant 0 : i32
    return %c0_i32, %c0_i32_0 : i32, i32
  }
  func.func @transform_2(%arg0: i32) -> (i32, i32) {
    %c0_i32 = arith.constant 0 : i32
    %c0_i32_0 = arith.constant 0 : i32
    %c0_i32_1 = arith.constant 0 : i32
    return %c0_i32, %c0_i32_0 : i32, i32
  }
  func.func @transform_3(%arg0: i32) -> (i32, i32) {
    %c0_i32 = arith.constant 0 : i32
    %c0_i32_0 = arith.constant 0 : i32
    %c0_i32_1 = arith.constant 0 : i32
    return %c0_i32, %c0_i32_0 : i32, i32
  }
  func.func @transform_4(%arg0: i32) -> (i32, i32) {
    %c0_i32 = arith.constant 0 : i32
    %c0_i32_0 = arith.constant 0 : i32
    %c0_i32_1 = arith.constant 0 : i32
    return %c0_i32, %c0_i32_0 : i32, i32
  }
  func.func @transform_5(%arg0: i32) -> (i32, i32) {
    %c0_i32 = arith.constant 0 : i32
    %c0_i32_0 = arith.constant 0 : i32
    %c0_i32_1 = arith.constant 0 : i32
    return %c0_i32, %c0_i32_0 : i32, i32
  }
  func.func @transform_6(%arg0: i32) -> (i32, i32) {
    %c0_i32 = arith.constant 0 : i32
    %c0_i32_0 = arith.constant 0 : i32
    %c0_i32_1 = arith.constant 0 : i32
    return %c0_i32, %c0_i32_0 : i32, i32
  }
  func.func @transform_7(%arg0: i32) -> (i32, i32) {
    %c0_i32 = arith.constant 0 : i32
    %c0_i32_0 = arith.constant 0 : i32
    return %arg0, %c0_i32 : i32, i32
  }
}

module attributes {stable_mosaic.version = 11 : i64} {
  func.func @kernel(%arg0: i32, %arg1: memref<8x12xf32, #tpu.memory_space<vmem>>, %arg2: memref<12x32xbf16, #tpu.memory_space<vmem>>, %arg3: memref<32x32xbf16, #tpu.memory_space<vmem>>, %arg4: memref<32x128xbf16, #tpu.memory_space<vmem>>, %arg5: memref<1x32xf32, #tpu.memory_space<vmem>>, %arg6: memref<1x32xf32, #tpu.memory_space<vmem>>, %arg7: memref<1x128xf32, #tpu.memory_space<vmem>>, %arg8: memref<8x128xf32, #tpu.memory_space<vmem>>) attributes {dimension_semantics = [#tpu.dimension_semantics<parallel>], iteration_bounds = array<i64: 1>, scalar_prefetch = 0 : i64, scratch_operands = 0 : i64, tpu.core_type = #tpu.core_type<tc>, window_params = [{transform_indices = @transform_0, window_bounds = array<i64: 8, 12>}, {pipeline_mode = #tpu.pipeline_mode<synchronous>, transform_indices = @transform_1, window_bounds = array<i64: 12, 32>}, {pipeline_mode = #tpu.pipeline_mode<synchronous>, transform_indices = @transform_2, window_bounds = array<i64: 32, 32>}, {pipeline_mode = #tpu.pipeline_mode<synchronous>, transform_indices = @transform_3, window_bounds = array<i64: 32, 128>}, {pipeline_mode = #tpu.pipeline_mode<synchronous>, transform_indices = @transform_4, window_bounds = array<i64: 1, 32>}, {pipeline_mode = #tpu.pipeline_mode<synchronous>, transform_indices = @transform_5, window_bounds = array<i64: 1, 32>}, {pipeline_mode = #tpu.pipeline_mode<synchronous>, transform_indices = @transform_6, window_bounds = array<i64: 1, 128>}, {transform_indices = @transform_7, window_bounds = array<i64: 8, 128>}]} {
    %c0 = arith.constant 0 : index
    %c0_0 = arith.constant 0 : index
    %0 = vector.load %arg1[%c0, %c0_0] : memref<8x12xf32, #tpu.memory_space<vmem>>, vector<8x12xf32>
    %1 = arith.truncf %0 : vector<8x12xf32> to vector<8x12xbf16>
    %c0_1 = arith.constant 0 : index
    %c0_2 = arith.constant 0 : index
    %2 = vector.load %arg2[%c0_1, %c0_2] : memref<12x32xbf16, #tpu.memory_space<vmem>>, vector<12x32xbf16>
    %cst = arith.constant dense<0.000000e+00> : vector<8x32xf32>
    %3 = tpu.matmul %1, %2, %cst {dimension_numbers = #tpu.dot_dimension_numbers<[1], [0], [0], [1], [0, 0, 1, 1], [], []>} : vector<8x12xbf16>, vector<12x32xbf16>, vector<8x32xf32> -> vector<8x32xf32>
    %c0_3 = arith.constant 0 : index
    %c0_4 = arith.constant 0 : index
    %4 = vector.load %arg5[%c0_3, %c0_4] : memref<1x32xf32, #tpu.memory_space<vmem>>, vector<1x32xf32>
    %5 = vector.broadcast %4 : vector<1x32xf32> to vector<8x32xf32>
    %6 = arith.addf %3, %5 : vector<8x32xf32>
    %cst_5 = arith.constant 0.000000e+00 : f32
    %7 = vector.broadcast %cst_5 : f32 to vector<8x32xf32>
    %8 = arith.maximumf %6, %7 : vector<8x32xf32>
    %9 = arith.truncf %8 : vector<8x32xf32> to vector<8x32xbf16>
    %c0_6 = arith.constant 0 : index
    %c0_7 = arith.constant 0 : index
    %10 = vector.load %arg3[%c0_6, %c0_7] : memref<32x32xbf16, #tpu.memory_space<vmem>>, vector<32x32xbf16>
    %cst_8 = arith.constant dense<0.000000e+00> : vector<8x32xf32>
    %11 = tpu.matmul %9, %10, %cst_8 {dimension_numbers = #tpu.dot_dimension_numbers<[1], [0], [0], [1], [0, 0, 1, 1], [], []>} : vector<8x32xbf16>, vector<32x32xbf16>, vector<8x32xf32> -> vector<8x32xf32>
    %c0_9 = arith.constant 0 : index
    %c0_10 = arith.constant 0 : index
    %12 = vector.load %arg6[%c0_9, %c0_10] : memref<1x32xf32, #tpu.memory_space<vmem>>, vector<1x32xf32>
    %13 = vector.broadcast %12 : vector<1x32xf32> to vector<8x32xf32>
    %14 = arith.addf %11, %13 : vector<8x32xf32>
    %cst_11 = arith.constant 0.000000e+00 : f32
    %15 = vector.broadcast %cst_11 : f32 to vector<8x32xf32>
    %16 = arith.maximumf %14, %15 : vector<8x32xf32>
    %17 = arith.truncf %16 : vector<8x32xf32> to vector<8x32xbf16>
    %c0_12 = arith.constant 0 : index
    %c0_13 = arith.constant 0 : index
    %18 = vector.load %arg4[%c0_12, %c0_13] : memref<32x128xbf16, #tpu.memory_space<vmem>>, vector<32x128xbf16>
    %cst_14 = arith.constant dense<0.000000e+00> : vector<8x128xf32>
    %19 = tpu.matmul %17, %18, %cst_14 {dimension_numbers = #tpu.dot_dimension_numbers<[1], [0], [0], [1], [0, 0, 1, 1], [], []>} : vector<8x32xbf16>, vector<32x128xbf16>, vector<8x128xf32> -> vector<8x128xf32>
    %c0_15 = arith.constant 0 : index
    %c0_16 = arith.constant 0 : index
    %20 = vector.load %arg7[%c0_15, %c0_16] : memref<1x128xf32, #tpu.memory_space<vmem>>, vector<1x128xf32>
    %21 = vector.broadcast %20 : vector<1x128xf32> to vector<8x128xf32>
    %22 = arith.addf %19, %21 : vector<8x128xf32>
    %23 = math.tanh %22 : vector<8x128xf32>
    %c0_17 = arith.constant 0 : index
    %c0_18 = arith.constant 0 : index
    %24 = vector.load %arg8[%c0_17, %c0_18] : memref<8x128xf32, #tpu.memory_space<vmem>>, vector<8x128xf32>
    tpu.vector_store %arg8[%c0_17, %c0_18], %23 {strides = array<i32>} : memref<8x128xf32, #tpu.memory_space<vmem>>, vector<8x128xf32>,
    return
  }
  func.func @transform_0(%arg0: i32) -> (i32, i32) {
    %c0_i32 = arith.constant 0 : i32
    %c0_i32_0 = arith.constant 0 : i32
    return %arg0, %c0_i32 : i32, i32
  }
  func.func @transform_1(%arg0: i32) -> (i32, i32) {
    %c0_i32 = arith.constant 0 : i32
    %c0_i32_0 = arith.constant 0 : i32
    %c0_i32_1 = arith.constant 0 : i32
    return %c0_i32, %c0_i32_0 : i32, i32
  }
  func.func @transform_2(%arg0: i32) -> (i32, i32) {
    %c0_i32 = arith.constant 0 : i32
    %c0_i32_0 = arith.constant 0 : i32
    %c0_i32_1 = arith.constant 0 : i32
    return %c0_i32, %c0_i32_0 : i32, i32
  }
  func.func @transform_3(%arg0: i32) -> (i32, i32) {
    %c0_i32 = arith.constant 0 : i32
    %c0_i32_0 = arith.constant 0 : i32
    %c0_i32_1 = arith.constant 0 : i32
    return %c0_i32, %c0_i32_0 : i32, i32
  }
  func.func @transform_4(%arg0: i32) -> (i32, i32) {
    %c0_i32 = arith.constant 0 : i32
    %c0_i32_0 = arith.constant 0 : i32
    %c0_i32_1 = arith.constant 0 : i32
    return %c0_i32, %c0_i32_0 : i32, i32
  }
  func.func @transform_5(%arg0: i32) -> (i32, i32) {
    %c0_i32 = arith.constant 0 : i32
    %c0_i32_0 = arith.constant 0 : i32
    %c0_i32_1 = arith.constant 0 : i32
    return %c0_i32, %c0_i32_0 : i32, i32
  }
  func.func @transform_6(%arg0: i32) -> (i32, i32) {
    %c0_i32 = arith.constant 0 : i32
    %c0_i32_0 = arith.constant 0 : i32
    %c0_i32_1 = arith.constant 0 : i32
    return %c0_i32, %c0_i32_0 : i32, i32
  }
  func.func @transform_7(%arg0: i32) -> (i32, i32) {
    %c0_i32 = arith.constant 0 : i32
    %c0_i32_0 = arith.constant 0 : i32
    return %arg0, %c0_i32 : i32, i32
  }
}

</mosaic_0001>

<bundles_post_ra>
// kernel: _mlp_forward_fused.1
= control target key start
LH: loop header
LB: loop body
LE: loop exit
PB: predicated region body
PF: predicated region fallthrough
CT: control target
= control target key end

     0   :  { %12 = vsyncpa [#allocation3], 0  ;;  %s435_s0 = inlined_call_operand.vmem [shape: f32[8,12], index: 0, kind: input, shape index: {}]   ;;  %s436_s1 = inlined_call_operand.hbm [shape: bf16[12,32], index: 1, kind: input, shape index: {}]   ;;  %s437_s2 = inlined_call_operand.vmem [shape: bf16[32,32], index: 2, kind: input, shape index: {}]   ;;  %s438_s3 = inlined_call_operand.hbm [shape: bf16[32,128], index: 3, kind: input, shape index: {}]   ;;  %s439_s4 = inlined_call_operand.vmem [shape: f32[1,32], index: 4, kind: input, shape index: {}]   ;;  %s440_s5 = inlined_call_operand.vmem [shape: f32[1,32], index: 5, kind: input, shape index: {}]   ;;  %s441_s6 = inlined_call_operand.vmem [shape: f32[1,128], index: 6, kind: input, shape index: {}]   ;;  %s442_s7 = inlined_call_operand.vmem [shape: f32[8,128], index: 7, kind: output, shape index: {}]  }
   0x1   :  { %13 = vsyncpa [#allocation5], 0  ;;  %s362_s24 = smov [#allocation2]  }
   0x2   :  { %s21_s25 = sshll.u32 %s362_s24, 4  ;;  %s22_s25 = int_to_ptr.vmem [resolvable:$true] %s21_s25 }
   0x3   :  { %s326_s26 = scalar_lea.vmem %s22_s25, 128  ;;  %p331_p1 = scmp.lt.s32.totalorder %s22_s25, %s22_s25 }
   0x4   :  { %p327_p0 = scmp.ne.s32.totalorder %s22_s25, %s326_s26  ;;  %p332_p2 = scmp.lt.s32.totalorder %s326_s26, %s326_s26 }
   0x6   :  { %p333_p3 = por %p332_p2, %p331_p1 }
   0x8   :  { %p334_p4 = pnand %p333_p3, %p327_p0 }
   0xa   :  { %337 = shalt.err (!%p334_p4)
}
   0xb   :  { %s363_s27 = smov 64   ;;  %s364_s28 = smov 4  }
   0xc   :  { %27 = dma.hbm_to_vmem [thread:$0]  %s436_s1, 128, %s22_s25, [#allocation3], %s363_s27, %s363_s27, %s364_s28  }
   0xd   :  { %s365_s8 = smov [#allocation4]  }
   0xe   :  { %s35_s9 = sshll.u32 %s365_s8, 4  ;;  %s36_s9 = int_to_ptr.vmem [resolvable:$true] %s35_s9 }
   0xf   :  { %s346_s10 = scalar_lea.vmem %s36_s9, 256  ;;  %p351_p6 = scmp.lt.s32.totalorder %s36_s9, %s36_s9 }
  0x10   :  { %p347_p5 = scmp.ne.s32.totalorder %s36_s9, %s346_s10  ;;  %p352_p7 = scmp.lt.s32.totalorder %s346_s10, %s346_s10 }
  0x12   :  { %p353_p8 = por %p352_p7, %p351_p6 }
  0x14   :  { %p354_p9 = pnand %p353_p8, %p347_p5 }
  0x16   :  { %357 = shalt.err (!%p354_p9)
}
  0x17   :  { %41 = dma.hbm_to_vmem [thread:$0]  %s438_s3, 256, %s36_s9, [#allocation5], %s363_s27, %s363_s27, %s364_s28  }
  0x18   :  { %358 = dma.done.wait [#allocation3], 128  }
  0x19   :  { %359 = vsyncadd [#allocation3], 4294967168 }
  0x1a   :  { %360 = dma.done.wait [#allocation5], 256  }
  0x1b   :  { %361 = vsyncadd [#allocation5], 4294967040  ;;  %v366_v0 = vmov 0.0   ;;  %vm367_vm0 = vmmov 0   ;;  %vm75_vm1 = vcmask 1045504   ;;  %v55_v2 = vld [vmem:[%s435_s0] sm:$0xff] }
  0x1c   :  { %283 = vmatprep.subr.bf16.mxu0 %v366_v0  ;;  %285 = vmatprep.mubr.msk.bf16.mxu0 %vm367_vm0, %v366_v0  ;;  %v311_v1 = vld [vmem:[#allocation2] sm:$0x3f]   ;;  %v56_v4 = vpack.c.bf16 %v55_v2, %v55_v2  ;;  %vm71_vm2 = vcmask 97280   ;;  %v312_v5 = vld [vmem:[%s437_s2 + $0x8] sm:$0xff]   ;;  %v314_v7 = vld [vmem:[#allocation4 + $0x8] sm:$0xff]   ;;  %vm144_vm3 = vcmask 261120  }
  0x1d   :  { %289 = vmatprep.subr.bf16.mxu1 %v366_v0  ;;  %293 = vmatprep.mubr.msk.bf16.mxu1 %vm367_vm0, %v366_v0  ;;  %v77_v3 = vsel %vm75_vm1, %v311_v1, 0  ;;  %v313_v6 = vld [vmem:[%s437_s2] sm:$0xff]   ;;  %v315_v16 = vld [vmem:[#allocation4] sm:$0xff]  }
  0x1e   :  { %284 = vmatpush3.bf16.msra.mxu0 %v77_v3  ;;  %290 = vmatpush3.bf16.msra.mxu1 %v312_v5  ;;  %v264_v8 = vld [vmem:[%s439_s4] ss:$0 sm:$0xff] }
  0x1f   :  { %297 = vmatprep.subr.bf16.mxu0 %v366_v0  ;;  %291 = vmatprep.subr.bf16.mxu1 %v366_v0  ;;  %v267_v17 = vld [vmem:[%s440_s5] ss:$0 sm:$0xff] }
  0x20   :  { %v271_v25 = vld [vmem:[%s441_s6] ss:$0 sm:$0xff] }
  0x21   :  { %286 = vmatmul.mubr.msk.bf16.vlgmr.msra.gmra.mxu0 %vm71_vm2, %v56_v4 }
  0x22   :  { %301 = vmatprep.mubr.msk.bf16.mxu0 %vm367_vm0, %v366_v0  ;;  %292 = vmatpush3.bf16.msra.mxu1 %v313_v6 }
  0x23   :  { %298 = vmatpush3.bf16.msra.mxu0 %v314_v7 }
  0x24   :  { %299 = vmatprep.subr.bf16.mxu0 %v366_v0 }
  0x27   :  { %300 = vmatpush3.bf16.msra.mxu0 %v315_v16 }
  0xe1   :  { %v113_v9 = vpop.f32.mrf.mxu0 }
  0xe2   :  { %v114_v10 = vadd.f32 %v264_v8, %v113_v9 }
  0xe3   :  { %v287_v11 = vpop.f32.mrf.mxu0 }
  0xe4   :  { %v119_v12 = vmax.f32 %v114_v10, 0.0 }
  0xe5   :  { %v116_v13 = vpop.f32.mrf.mxu0 }
  0xe6   :  { %v120_v14 = vpack.c.bf16 %v119_v12, %v119_v12 }
  0xe7   :  { %v288_v15 = vpop.f32.mrf.mxu0 }
  0xe8   :  { %294 = vmatmul.mubr.msk.bf16.vlgmr.msra.gmra.mxu1 %vm144_vm3, %v120_v14 }
 0x1a8   :  { %v182_v18 = vpop.f32.mrf.mxu1 }
 0x1a9   :  { %v183_v19 = vadd.f32 %v267_v17, %v182_v18 }
 0x1aa   :  { %v295_v20 = vpop.f32.mrf.mxu1 }
 0x1ab   :  { %v188_v21 = vmax.f32 %v183_v19, 0.0 }
 0x1ac   :  { %v185_v22 = vpop.f32.mrf.mxu1 }
 0x1ad   :  { %v189_v23 = vpack.c.bf16 %v188_v21, %v188_v21 }
 0x1ae   :  { %v296_v24 = vpop.f32.mrf.mxu1 }
 0x1af   :  { %302 = vmatmul.mubr.msk.bf16.vlgmr.msra.gmra.mxu0 %vm144_vm3, %v189_v23 }
 0x26f   :  { %v250_v26 = vpop.f32.mrf.mxu0 }
 0x270   :  { %v251_v27 = vadd.f32 %v271_v25, %v250_v26 }
 0x271   :  { %v303_v28 = vpop.f32.mrf.mxu0 }
 0x272   :  { %316 = vtanh.f32 %v251_v27 }
 0x273   :  { %v253_v29 = vpop.f32.mrf.mxu0 }
 0x275   :  { %v304_v30 = vpop.f32.mrf.mxu0 }
 0x27f   :  { %v317_v31 = vpop.eup %316 }
 0x280   :  { %257 = vst [vmem:[%s442_s7] sm:$0xff] %v317_v31 }
 0x281   :  { %262 = vsyncpa [#allocation3], 1 }
 0x282   :  { %263 = vsyncpa [#allocation5], 1 }

// kernel: _mlp_forward_fused.1
= control target key start
LH: loop header
LB: loop body
LE: loop exit
PB: predicated region body
PF: predicated region fallthrough
CT: control target
= control target key end

     0   :  { %12 = vsyncpa [#allocation3], 0  ;;  %s435_s0 = inlined_call_operand.vmem [shape: f32[8,12], index: 0, kind: input, shape index: {}]   ;;  %s436_s1 = inlined_call_operand.hbm [shape: bf16[12,32], index: 1, kind: input, shape index: {}]   ;;  %s437_s2 = inlined_call_operand.vmem [shape: bf16[32,32], index: 2, kind: input, shape index: {}]   ;;  %s438_s3 = inlined_call_operand.hbm [shape: bf16[32,128], index: 3, kind: input, shape index: {}]   ;;  %s439_s4 = inlined_call_operand.vmem [shape: f32[1,32], index: 4, kind: input, shape index: {}]   ;;  %s440_s5 = inlined_call_operand.vmem [shape: f32[1,32], index: 5, kind: input, shape index: {}]   ;;  %s441_s6 = inlined_call_operand.vmem [shape: f32[1,128], index: 6, kind: input, shape index: {}]   ;;  %s442_s7 = inlined_call_operand.vmem [shape: f32[8,128], index: 7, kind: output, shape index: {}]  }
   0x1   :  { %13 = vsyncpa [#allocation5], 0  ;;  %s362_s24 = smov [#allocation2]  }
   0x2   :  { %s21_s25 = sshll.u32 %s362_s24, 4  ;;  %s22_s25 = int_to_ptr.vmem [resolvable:$true] %s21_s25 }
   0x3   :  { %s326_s26 = scalar_lea.vmem %s22_s25, 128  ;;  %p331_p1 = scmp.lt.s32.totalorder %s22_s25, %s22_s25 }
   0x4   :  { %p327_p0 = scmp.ne.s32.totalorder %s22_s25, %s326_s26  ;;  %p332_p2 = scmp.lt.s32.totalorder %s326_s26, %s326_s26 }
   0x6   :  { %p333_p3 = por %p332_p2, %p331_p1 }
   0x8   :  { %p334_p4 = pnand %p333_p3, %p327_p0 }
   0xa   :  { %337 = shalt.err (!%p334_p4)
}
   0xb   :  { %s363_s27 = smov 64   ;;  %s364_s28 = smov 4  }
   0xc   :  { %27 = dma.hbm_to_vmem [thread:$0]  %s436_s1, 128, %s22_s25, [#allocation3], %s363_s27, %s363_s27, %s364_s28  }
   0xd   :  { %s365_s8 = smov [#allocation4]  }
   0xe   :  { %s35_s9 = sshll.u32 %s365_s8, 4  ;;  %s36_s9 = int_to_ptr.vmem [resolvable:$true] %s35_s9 }
   0xf   :  { %s346_s10 = scalar_lea.vmem %s36_s9, 256  ;;  %p351_p6 = scmp.lt.s32.totalorder %s36_s9, %s36_s9 }
  0x10   :  { %p347_p5 = scmp.ne.s32.totalorder %s36_s9, %s346_s10  ;;  %p352_p7 = scmp.lt.s32.totalorder %s346_s10, %s346_s10 }
  0x12   :  { %p353_p8 = por %p352_p7, %p351_p6 }
  0x14   :  { %p354_p9 = pnand %p353_p8, %p347_p5 }
  0x16   :  { %357 = shalt.err (!%p354_p9)
}
  0x17   :  { %41 = dma.hbm_to_vmem [thread:$0]  %s438_s3, 256, %s36_s9, [#allocation5], %s363_s27, %s363_s27, %s364_s28  }
  0x18   :  { %358 = dma.done.wait [#allocation3], 128  }
  0x19   :  { %359 = vsyncadd [#allocation3], 4294967168 }
  0x1a   :  { %360 = dma.done.wait [#allocation5], 256  }
  0x1b   :  { %361 = vsyncadd [#allocation5], 4294967040  ;;  %v366_v0 = vmov 0.0   ;;  %vm367_vm0 = vmmov 0   ;;  %vm75_vm1 = vcmask 1045504   ;;  %v55_v2 = vld [vmem:[%s435_s0] sm:$0xff] }
  0x1c   :  { %283 = vmatprep.subr.bf16.mxu0 %v366_v0  ;;  %285 = vmatprep.mubr.msk.bf16.mxu0 %vm367_vm0, %v366_v0  ;;  %v311_v1 = vld [vmem:[#allocation2] sm:$0x3f]   ;;  %v56_v4 = vpack.c.bf16 %v55_v2, %v55_v2  ;;  %vm71_vm2 = vcmask 97280   ;;  %v312_v5 = vld [vmem:[%s437_s2 + $0x8] sm:$0xff]   ;;  %v314_v7 = vld [vmem:[#allocation4 + $0x8] sm:$0xff]   ;;  %vm144_vm3 = vcmask 261120  }
  0x1d   :  { %289 = vmatprep.subr.bf16.mxu1 %v366_v0  ;;  %293 = vmatprep.mubr.msk.bf16.mxu1 %vm367_vm0, %v366_v0  ;;  %v77_v3 = vsel %vm75_vm1, %v311_v1, 0  ;;  %v313_v6 = vld [vmem:[%s437_s2] sm:$0xff]   ;;  %v315_v16 = vld [vmem:[#allocation4] sm:$0xff]  }
  0x1e   :  { %284 = vmatpush3.bf16.msra.mxu0 %v77_v3  ;;  %290 = vmatpush3.bf16.msra.mxu1 %v312_v5  ;;  %v264_v8 = vld [vmem:[%s439_s4] ss:$0 sm:$0xff] }
  0x1f   :  { %297 = vmatprep.subr.bf16.mxu0 %v366_v0  ;;  %291 = vmatprep.subr.bf16.mxu1 %v366_v0  ;;  %v267_v17 = vld [vmem:[%s440_s5] ss:$0 sm:$0xff] }
  0x20   :  { %v271_v25 = vld [vmem:[%s441_s6] ss:$0 sm:$0xff] }
  0x21   :  { %286 = vmatmul.mubr.msk.bf16.vlgmr.msra.gmra.mxu0 %vm71_vm2, %v56_v4 }
  0x22   :  { %301 = vmatprep.mubr.msk.bf16.mxu0 %vm367_vm0, %v366_v0  ;;  %292 = vmatpush3.bf16.msra.mxu1 %v313_v6 }
  0x23   :  { %298 = vmatpush3.bf16.msra.mxu0 %v314_v7 }
  0x24   :  { %299 = vmatprep.subr.bf16.mxu0 %v366_v0 }
  0x27   :  { %300 = vmatpush3.bf16.msra.mxu0 %v315_v16 }
  0xe1   :  { %v113_v9 = vpop.f32.mrf.mxu0 }
  0xe2   :  { %v114_v10 = vadd.f32 %v264_v8, %v113_v9 }
  0xe3   :  { %v287_v11 = vpop.f32.mrf.mxu0 }
  0xe4   :  { %v119_v12 = vmax.f32 %v114_v10, 0.0 }
  0xe5   :  { %v116_v13 = vpop.f32.mrf.mxu0 }
  0xe6   :  { %v120_v14 = vpack.c.bf16 %v119_v12, %v119_v12 }
  0xe7   :  { %v288_v15 = vpop.f32.mrf.mxu0 }
  0xe8   :  { %294 = vmatmul.mubr.msk.bf16.vlgmr.msra.gmra.mxu1 %vm144_vm3, %v120_v14 }
 0x1a8   :  { %v182_v18 = vpop.f32.mrf.mxu1 }
 0x1a9   :  { %v183_v19 = vadd.f32 %v267_v17, %v182_v18 }
 0x1aa   :  { %v295_v20 = vpop.f32.mrf.mxu1 }
 0x1ab   :  { %v188_v21 = vmax.f32 %v183_v19, 0.0 }
 0x1ac   :  { %v185_v22 = vpop.f32.mrf.mxu1 }
 0x1ad   :  { %v189_v23 = vpack.c.bf16 %v188_v21, %v188_v21 }
 0x1ae   :  { %v296_v24 = vpop.f32.mrf.mxu1 }
 0x1af   :  { %302 = vmatmul.mubr.msk.bf16.vlgmr.msra.gmra.mxu0 %vm144_vm3, %v189_v23 }
 0x26f   :  { %v250_v26 = vpop.f32.mrf.mxu0 }
 0x270   :  { %v251_v27 = vadd.f32 %v271_v25, %v250_v26 }
 0x271   :  { %v303_v28 = vpop.f32.mrf.mxu0 }
 0x272   :  { %316 = vtanh.f32 %v251_v27 }
 0x273   :  { %v253_v29 = vpop.f32.mrf.mxu0 }
 0x275   :  { %v304_v30 = vpop.f32.mrf.mxu0 }
 0x27f   :  { %v317_v31 = vpop.eup %316 }
 0x280   :  { %257 = vst [vmem:[%s442_s7] sm:$0xff] %v317_v31 }
 0x281   :  { %262 = vsyncpa [#allocation3], 1 }
 0x282   :  { %263 = vsyncpa [#allocation5], 1 }

</bundles_post_ra>
